<compile_context>
chip_gen: v5e
topology: v5e:2x2
jax: 0.10.0
libtpu: 0.0.40
codegen_flags: <defaults>
</compile_context>

<pallas_src>
import functools

import jax
import jax.numpy as jnp
from jax.experimental import pallas as pl
from jax.experimental.pallas import tpu as pltpu

_HALO = 128                      # lane width of the halo block; covers d*(K-1) <= 128*stride
_VMEM_BUDGET = 24 * 1024 * 1024  # per-kernel VMEM target, fits v7x's 32 MiB scoped default


def _round_up(x, m):
    return (x + m - 1) // m * m


def _make_kernel(C_in_pad, C_out, K, TL, stride, dilation, compute_dtype):
    # Tap k reads padded input index t*stride + k*dilation == (t + q_k)*stride + r_k.
    q_offs = [(k * dilation) // stride for k in range(K)]
    r_offs = [(k * dilation) % stride for k in range(K)]

    def kernel(thr_ref, xm_ref, xh_ref, w_ref, o_ref, slab_ref):
        thr = thr_ref[0]

        def prune(v):
            # Runtime pruning in f32 on the VPU, cast fused into the slab write.
            return jnp.where(jnp.abs(v) >= thr, v, 0.0).astype(compute_dtype)

        # Build the im2col slab directly in VMEM scratch:
        #   slab[k*C_in_pad + c, t] = x_pruned[c, t*stride + k*dilation]
        # Each tap is one (C_in_pad, *) write from the main tile plus (when the
        # window reaches past the tile) one write from the 128-lane halo block.
        for k in range(K):
            q, r = q_offs[k], r_offs[k]
            r0 = k * C_in_pad
            r1 = r0 + C_in_pad
            if q < TL:
                xm = xm_ref[0, r]                      # (C_in_pad, TL) f32
                slab_ref[r0:r1, 0:TL - q] = prune(xm[:, q:TL])
            if q > 0:
                xh = xh_ref[0, r]                      # (C_in_pad, _HALO) f32
                slab_ref[r0:r1, TL - q:TL] = prune(xh[:, 0:q])

        # Single fused MXU matmul, f32 accumulation.
        o_ref[0] = jnp.dot(
            w_ref[...], slab_ref[...],
            preferred_element_type=jnp.float32).astype(o_ref.dtype)

    return kernel


@functools.partial(
    jax.jit,
    static_argnames=("stride", "padding", "dilation", "tl", "compute_dtype"))
def rtp_conv1d(x, weight, stride, padding, dilation, threshold,
               *, tl=1024, compute_dtype=jnp.float32):
    """Pallas implementation of rtp_core.rtp_conv1d (groups=1, no bias)."""
    N, C_in, L = x.shape
    C_out, C_in_w, K = weight.shape
    assert C_in_w == C_in, "groups != 1 not supported"
    assert dilation * (K - 1) <= _HALO * stride, (
        "conv window wider than the 128-lane halo block")

    L_out = (L + 2 * padding - dilation * (K - 1) - 1) // stride + 1
    assert L_out > 0, "empty output"

    cdt = jnp.dtype(compute_dtype)
    # Pad C_in to the slab's sublane multiple (8 for f32, 16 for bf16) so tap
    # chunks and the (K*C_in_pad, TL) slab are (8,128)-tile aligned.
    sublane = 16 if cdt.itemsize == 2 else 8
    C_in_pad = _round_up(C_in, sublane)

    # ---- choose TL: output-length tile, multiple of 128 lanes ----
    TL = min(_round_up(tl, 128), _round_up(L_out, 128))
    # v7x megacore: keep >= 2 parallel grid units when batch is 1.
    if N == 1 and L_out > 128:
        TL = min(TL, _round_up(pl.cdiv(L_out, 2), 128))

    def vmem_bytes(t):
        return (2 * stride * C_in_pad * (t + _HALO) * 4        # x main+halo (dbuf, f32)
                + 2 * C_out * K * C_in_pad * cdt.itemsize      # weight (dbuf)
                + K * C_in_pad * t * cdt.itemsize              # slab scratch
                + 2 * C_out * t * 4)                           # out (dbuf, f32)

    # Shrink the tile until the double-buffered footprint fits the budget
    # (matters for large channel counts, especially on v7x's 64 MiB VMEM).
    while TL > 128 and vmem_bytes(TL) > _VMEM_BUDGET:
        TL -= 128

    num_l_tiles = pl.cdiv(L_out, TL)
    L_out_pad = num_l_tiles * TL

    # Stride decomposition: padded input index i -> (q, r), i = q*stride + r.
    # Layout (N, stride, C_in_pad, Lq): C_in on sublanes, Lq on lanes, so each
    # per-tap read is a contiguous lane slice at a fixed leading index.
    Lq = L_out_pad + _HALO
    L_total = Lq * stride
    right_pad = L_total - L - padding
    # TODO(synk): this pad materializes one extra HBM copy of x; folding the
    # zero-padding into the kernel would need per-edge masking (see header).
    x_pad = jnp.pad(x, ((0, 0), (0, C_in_pad - C_in), (padding, right_pad)))
    x_proc = jnp.transpose(x_pad.reshape(N, C_in_pad, Lq, stride), (0, 3, 1, 2))

    # Weight flattened so the kernel does one matmul with contraction K*C_in_pad:
    #   w_flat[o, k*C_in_pad + c] = weight[o, c, k]   (zero for padded channels)
    w_pad = jnp.pad(weight, ((0, 0), (0, C_in_pad - C_in), (0, 0)))
    w_flat = jnp.transpose(w_pad, (0, 2, 1)).reshape(C_out, K * C_in_pad)
    w_flat = w_flat.astype(compute_dtype)

    thr = jnp.reshape(jnp.asarray(threshold, jnp.float32), (1,))

    kernel = _make_kernel(C_in_pad, C_out, K, TL, stride, dilation, cdt)
    halo_blocks_per_tile = TL // _HALO

    fp = vmem_bytes(TL)
    vmem_limit = int(min(48 * 1024 * 1024, max(32 * 1024 * 1024, 2 * fp)))

    out = pl.pallas_call(
        kernel,
        out_shape=jax.ShapeDtypeStruct((N, C_out, L_out_pad), x.dtype),
        grid_spec=pltpu.PrefetchScalarGridSpec(
            num_scalar_prefetch=0,
            grid=(N, num_l_tiles),
            in_specs=[
                pl.BlockSpec(memory_space=pltpu.SMEM),               # threshold
                pl.BlockSpec((1, stride, C_in_pad, TL),              # x main tile
                             lambda n, l: (n, 0, 0, l)),
                pl.BlockSpec((1, stride, C_in_pad, _HALO),           # x halo (next 128 lanes)
                             lambda n, l: (n, 0, 0, (l + 1) * halo_blocks_per_tile)),
                pl.BlockSpec((C_out, K * C_in_pad),                  # flattened weight, resident
                             lambda n, l: (0, 0)),
            ],
            out_specs=pl.BlockSpec((1, C_out, TL), lambda n, l: (n, 0, l)),
            scratch_shapes=[pltpu.VMEM((K * C_in_pad, TL), cdt)],    # im2col slab
        ),
        compiler_params=pltpu.CompilerParams(
            dimension_semantics=("parallel", "parallel"),
            vmem_limit_bytes=vmem_limit),
    )(thr, x_proc, x_proc, w_flat)

    return out[:, :, :L_out]


def _reference_conv1d(x, weight, stride, padding, dilation, threshold):
    """Pure-JAX reference for correctness checking."""
    x = jnp.where(jnp.abs(x) >= threshold, x, jnp.zeros_like(x))
    return jax.lax.conv_general_dilated(
        x, weight,
        window_strides=(stride,),
        padding=[(padding, padding)],
        rhs_dilation=(dilation,),
        dimension_numbers=("NCH", "OIH", "NCH"),
    )


if __name__ == "__main__":

    def run_case(name, N, C_in, C_out, K, L, stride, padding, dilation,
                 threshold, key, compute_dtype=jnp.float32, tol=1e-4):
        kx, kw = jax.random.split(key)
        x = jax.random.normal(kx, (N, C_in, L), dtype=jnp.float32)
        w = jax.random.normal(kw, (C_out, C_in, K), dtype=jnp.float32) * 0.1
        # NOTE: the module registers a bias buffer but forward() never uses it.
        out = rtp_conv1d(x, w, stride, padding, dilation, threshold,
                         compute_dtype=compute_dtype)
        out = jax.block_until_ready(out)
        ref = _reference_conv1d(x, w, stride, padding, dilation, threshold)
        assert out.shape == ref.shape, (name, out.shape, ref.shape)
        assert jnp.allclose(out, ref, atol=tol, rtol=tol), (
            f"mismatch vs reference: {name}")

    key = jax.random.PRNGKey(0)
    k1, k2, k3, k4 = jax.random.split(key, 4)

    # Module-sized config: in=4, out=8, K=3, stride=1, padding=1, N=2, L=16.
    run_case("stride1", 2, 4, 8, 3, 16, 1, 1, 1, 0.25, k1)
    # Strided config exercising the (q, r) stride decomposition.
    run_case("stride2", 2, 4, 8, 3, 16, 2, 1, 1, 0.25, k2)
    # Dilated, batch=1, multi-tile: exercises the halo path and the megacore
    # (>=2 parallel grid units) tile cap.
    run_case("dilated_multitile", 1, 8, 16, 3, 400, 1, 1, 2, 0.25, k3)
    # bf16 matmul operands (f32 accumulation) -- the v6e/v7x production path.
    run_case("bf16", 2, 4, 8, 3, 16, 1, 1, 1, 0.25, k4,
             compute_dtype=jnp.bfloat16, tol=5e-2)

    print("KERNEL_OK")
</pallas_src>

<mosaic_0001>
module attributes {stable_mosaic.version = 11 : i64} {
  func.func @kernel(%arg0: i32, %arg1: i32, %arg2: memref<1xf32, #tpu.memory_space<smem>>, %arg3: memref<1x1x8x128xf32, #tpu.memory_space<vmem>>, %arg4: memref<1x1x8x128xf32, #tpu.memory_space<vmem>>, %arg5: memref<8x24xf32, #tpu.memory_space<vmem>>, %arg6: memref<1x8x128xf32, #tpu.memory_space<vmem>>, %arg7: memref<24x128xf32, #tpu.memory_space<vmem>>) attributes {dimension_semantics = [#tpu.dimension_semantics<parallel>, #tpu.dimension_semantics<parallel>], iteration_bounds = array<i64: 2, 1>, scalar_prefetch = 0 : i64, scratch_operands = 1 : i64, tpu.core_type = #tpu.core_type<tc>, window_params = [{transform_indices = @transform_0, window_bounds = array<i64: 1>}, {transform_indices = @transform_1, window_bounds = array<i64: 1, 1, 8, 128>}, {transform_indices = @transform_2, window_bounds = array<i64: 1, 1, 8, 128>}, {pipeline_mode = #tpu.pipeline_mode<synchronous>, transform_indices = @transform_3, window_bounds = array<i64: 8, 24>}, {transform_indices = @transform_4, window_bounds = array<i64: 1, 8, 128>}]} {
    %c0 = arith.constant 0 : index
    %0 = memref.load %arg2[%c0] : memref<1xf32, #tpu.memory_space<smem>>
    %c0_0 = arith.constant 0 : index
    %c0_1 = arith.constant 0 : index
    %c0_2 = arith.constant 0 : index
    %c0_3 = arith.constant 0 : index
    %1 = vector.load %arg3[%c0_0, %c0_1, %c0_2, %c0_3] : memref<1x1x8x128xf32, #tpu.memory_space<vmem>>, vector<1x1x8x128xf32>
    %2 = vector.shape_cast %1 : vector<1x1x8x128xf32> to vector<8x128xf32>
    %3 = math.absf %2 : vector<8x128xf32>
    %4 = vector.broadcast %0 : f32 to vector<8x128xf32>
    %5 = arith.cmpf oge, %3, %4 : vector<8x128xf32>
    %cst = arith.constant 0.000000e+00 : f32
    %6 = vector.broadcast %cst : f32 to vector<8x128xf32>
    %7 = arith.select %5, %2, %6 : vector<8x128xi1>, vector<8x128xf32>
    %c0_4 = arith.constant 0 : index
    %c0_5 = arith.constant 0 : index
    %8 = vector.load %arg7[%c0_4, %c0_5] : memref<24x128xf32, #tpu.memory_space<vmem>>, vector<8x128xf32>
    tpu.vector_store %arg7[%c0_4, %c0_5], %7 {strides = array<i32>} : memref<24x128xf32, #tpu.memory_space<vmem>>, vector<8x128xf32>,
    %c0_6 = arith.constant 0 : index
    %c0_7 = arith.constant 0 : index
    %c0_8 = arith.constant 0 : index
    %c0_9 = arith.constant 0 : index
    %9 = vector.load %arg3[%c0_6, %c0_7, %c0_8, %c0_9] : memref<1x1x8x128xf32, #tpu.memory_space<vmem>>, vector<1x1x8x128xf32>
    %10 = vector.shape_cast %9 : vector<1x1x8x128xf32> to vector<8x128xf32>
    %11 = vector.extract_strided_slice %10 {offsets = [0, 1], sizes = [8, 127], strides = [1, 1]} : vector<8x128xf32> to vector<8x127xf32>
    %12 = math.absf %11 : vector<8x127xf32>
    %13 = vector.broadcast %0 : f32 to vector<8x127xf32>
    %14 = arith.cmpf oge, %12, %13 : vector<8x127xf32>
    %cst_10 = arith.constant 0.000000e+00 : f32
    %15 = vector.broadcast %cst_10 : f32 to vector<8x127xf32>
    %16 = arith.select %14, %11, %15 : vector<8x127xi1>, vector<8x127xf32>
    %c8 = arith.constant 8 : index
    %c0_11 = arith.constant 0 : index
    %17 = vector.load %arg7[%c8, %c0_11] : memref<24x128xf32, #tpu.memory_space<vmem>>, vector<8x127xf32>
    tpu.vector_store %arg7[%c8, %c0_11], %16 {strides = array<i32>} : memref<24x128xf32, #tpu.memory_space<vmem>>, vector<8x127xf32>,
    %c0_12 = arith.constant 0 : index
    %c0_13 = arith.constant 0 : index
    %c0_14 = arith.constant 0 : index
    %c0_15 = arith.constant 0 : index
    %18 = vector.load %arg4[%c0_12, %c0_13, %c0_14, %c0_15] : memref<1x1x8x128xf32, #tpu.memory_space<vmem>>, vector<1x1x8x128xf32>
    %19 = vector.shape_cast %18 : vector<1x1x8x128xf32> to vector<8x128xf32>
    %20 = vector.extract_strided_slice %19 {offsets = [0, 0], sizes = [8, 1], strides = [1, 1]} : vector<8x128xf32> to vector<8x1xf32>
    %21 = math.absf %20 : vector<8x1xf32>
    %22 = vector.broadcast %0 : f32 to vector<8x1xf32>
    %23 = arith.cmpf oge, %21, %22 : vector<8x1xf32>
    %cst_16 = arith.constant 0.000000e+00 : f32
    %24 = vector.broadcast %cst_16 : f32 to vector<8x1xf32>
    %25 = arith.select %23, %20, %24 : vector<8x1xi1>, vector<8x1xf32>
    %c8_17 = arith.constant 8 : index
    %c127 = arith.constant 127 : index
    %26 = vector.load %arg7[%c8_17, %c127] : memref<24x128xf32, #tpu.memory_space<vmem>>, vector<8x1xf32>
    tpu.vector_store %arg7[%c8_17, %c127], %25 {strides = array<i32>} : memref<24x128xf32, #tpu.memory_space<vmem>>, vector<8x1xf32>,
    %c0_18 = arith.constant 0 : index
    %c0_19 = arith.constant 0 : index
    %c0_20 = arith.constant 0 : index
    %c0_21 = arith.constant 0 : index
    %27 = vector.load %arg3[%c0_18, %c0_19, %c0_20, %c0_21] : memref<1x1x8x128xf32, #tpu.memory_space<vmem>>, vector<1x1x8x128xf32>
    %28 = vector.shape_cast %27 : vector<1x1x8x128xf32> to vector<8x128xf32>
    %29 = vector.extract_strided_slice %28 {offsets = [0, 2], sizes = [8, 126], strides = [1, 1]} : vector<8x128xf32> to vector<8x126xf32>
    %30 = math.absf %29 : vector<8x126xf32>
    %31 = vector.broadcast %0 : f32 to vector<8x126xf32>
    %32 = arith.cmpf oge, %30, %31 : vector<8x126xf32>
    %cst_22 = arith.constant 0.000000e+00 : f32
    %33 = vector.broadcast %cst_22 : f32 to vector<8x126xf32>
    %34 = arith.select %32, %29, %33 : vector<8x126xi1>, vector<8x126xf32>
    %c16 = arith.constant 16 : index
    %c0_23 = arith.constant 0 : index
    %35 = vector.load %arg7[%c16, %c0_23] : memref<24x128xf32, #tpu.memory_space<vmem>>, vector<8x126xf32>
    tpu.vector_store %arg7[%c16, %c0_23], %34 {strides = array<i32>} : memref<24x128xf32, #tpu.memory_space<vmem>>, vector<8x126xf32>,
    %c0_24 = arith.constant 0 : index
    %c0_25 = arith.constant 0 : index
    %c0_26 = arith.constant 0 : index
    %c0_27 = arith.constant 0 : index
    %36 = vector.load %arg4[%c0_24, %c0_25, %c0_26, %c0_27] : memref<1x1x8x128xf32, #tpu.memory_space<vmem>>, vector<1x1x8x128xf32>
    %37 = vector.shape_cast %36 : vector<1x1x8x128xf32> to vector<8x128xf32>
    %38 = vector.extract_strided_slice %37 {offsets = [0, 0], sizes = [8, 2], strides = [1, 1]} : vector<8x128xf32> to vector<8x2xf32>
    %39 = math.absf %38 : vector<8x2xf32>
    %40 = vector.broadcast %0 : f32 to vector<8x2xf32>
    %41 = arith.cmpf oge, %39, %40 : vector<8x2xf32>
    %cst_28 = arith.constant 0.000000e+00 : f32
    %42 = vector.broadcast %cst_28 : f32 to vector<8x2xf32>
    %43 = arith.select %41, %38, %42 : vector<8x2xi1>, vector<8x2xf32>
    %c16_29 = arith.constant 16 : index
    %c126 = arith.constant 126 : index
    %44 = vector.load %arg7[%c16_29, %c126] : memref<24x128xf32, #tpu.memory_space<vmem>>, vector<8x2xf32>
    tpu.vector_store %arg7[%c16_29, %c126], %43 {strides = array<i32>} : memref<24x128xf32, #tpu.memory_space<vmem>>, vector<8x2xf32>,
    %c0_30 = arith.constant 0 : index
    %c0_31 = arith.constant 0 : index
    %45 = vector.load %arg5[%c0_30, %c0_31] : memref<8x24xf32, #tpu.memory_space<vmem>>, vector<8x24xf32>
    %c0_32 = arith.constant 0 : index
    %c0_33 = arith.constant 0 : index
    %46 = vector.load %arg7[%c0_32, %c0_33] : memref<24x128xf32, #tpu.memory_space<vmem>>, vector<24x128xf32>
    %cst_34 = arith.constant dense<0.000000e+00> : vector<8x128xf32>
    %47 = tpu.matmul %45, %46, %cst_34 {dimension_numbers = #tpu.dot_dimension_numbers<[1], [0], [0], [1], [0, 0, 1, 1], [], []>} : vector<8x24xf32>, vector<24x128xf32>, vector<8x128xf32> -> vector<8x128xf32>
    %c0_35 = arith.constant 0 : index
    %c0_36 = arith.constant 0 : index
    %c0_37 = arith.constant 0 : index
    %48 = vector.load %arg6[%c0_35, %c0_36, %c0_37] : memref<1x8x128xf32, #tpu.memory_space<vmem>>, vector<1x8x128xf32>
    %49 = vector.shape_cast %48 : vector<1x8x128xf32> to vector<8x128xf32>
    %50 = vector.shape_cast %47 : vector<8x128xf32> to vector<1x8x128xf32>
    tpu.vector_store %arg6[%c0_35, %c0_36, %c0_37], %50 {strides = array<i32>} : memref<1x8x128xf32, #tpu.memory_space<vmem>>, vector<1x8x128xf32>,
    return
  }
  func.func @transform_0(%arg0: i32, %arg1: i32) -> i32 {
    %c0_i32 = arith.constant 0 : i32
    %c0_i32_0 = arith.constant 0 : i32
    return %c0_i32 : i32
  }
  func.func @transform_1(%arg0: i32, %arg1: i32) -> (i32, i32, i32, i32) {
    %c0_i32 = arith.constant 0 : i32
    %c0_i32_0 = arith.constant 0 : i32
    %c0_i32_1 = arith.constant 0 : i32
    return %arg0, %c0_i32, %c0_i32_0, %arg1 : i32, i32, i32, i32
  }
  func.func @transform_2(%arg0: i32, %arg1: i32) -> (i32, i32, i32, i32) {
    %c1_i32 = arith.constant 1 : i32
    %0 = arith.addi %arg1, %c1_i32 : i32
    %c1_i32_0 = arith.constant 1 : i32
    %1 = arith.muli %0, %c1_i32_0 : i32
    %c0_i32 = arith.constant 0 : i32
    %c0_i32_1 = arith.constant 0 : i32
    %c0_i32_2 = arith.constant 0 : i32
    return %arg0, %c0_i32, %c0_i32_1, %1 : i32, i32, i32, i32
  }
  func.func @transform_3(%arg0: i32, %arg1: i32) -> (i32, i32) {
    %c0_i32 = arith.constant 0 : i32
    %c0_i32_0 = arith.constant 0 : i32
    %c0_i32_1 = arith.constant 0 : i32
    return %c0_i32, %c0_i32_0 : i32, i32
  }
  func.func @transform_4(%arg0: i32, %arg1: i32) -> (i32, i32, i32) {
    %c0_i32 = arith.constant 0 : i32
    %c0_i32_0 = arith.constant 0 : i32
    return %arg0, %c0_i32, %arg1 : i32, i32, i32
  }
}

</mosaic_0001>

<bundles_post_ra>
// kernel: rtp_conv1d.1
= control target key start
LH: loop header
LB: loop body
LE: loop exit
PB: predicated region body
PF: predicated region fallthrough
CT: control target
= control target key end

     0   :  { %s743_s0 = inlined_call_operand.<no memory space> [shape: f32[1], index: 0, kind: input, shape index: {}]   ;;  %s744_s1 = inlined_call_operand.vmem [shape: f32[2,1,8,256], index: 1, kind: input, shape index: {}, may-alias: {1,2}]   ;;  %s745_s2 = inlined_call_operand.vmem [shape: f32[2,1,8,256], index: 2, kind: input, shape index: {}, may-alias: {1,2}]   ;;  %s746_s3 = inlined_call_operand.vmem [shape: f32[8,24], index: 3, kind: input, shape index: {}]   ;;  %s747_s4 = inlined_call_operand.hbm [shape: f32[2,8,128], index: 4, kind: output, shape index: {}]  }
   0x1   :  { %9 = sst [smem:[#allocation3]] %s743_s0 }
   0x2   :  { %10 = vsyncpa [#allocation5], 0 }
   0x3   :  { %12 = vsyncpa [#allocation5 + $0x1], 0  ;;  %s632_s17 = smov 0   ;;  %s634_s18 = smov 0  }
   0x4   :  { %s636_s19 = smov 0   ;;  %s638_s20 = smov 0  }
   0x5   :  { %s640_s21 = smov 0   ;;  %s642_s22 = smov 0  }
   0x6 LB: > { %s445_s0 = sadd.s32 4294967295, %s600_s22   ;;  %s446_s23 = sadd.s32 4294967294, %s600_s22   ;;  %s600_s22 = sphi %s642_s22, %s18_s22   ;;  %s596_s21 = sphi %s640_s21, %s756_s21   ;;  %s592_s20 = sphi %s638_s20, %s755_s20   ;;  %s588_s19 = sphi %s636_s19, %s754_s19   ;;  %s584_s18 = sphi %s634_s18, %s753_s18   ;;  %s580_s17 = sphi %s632_s17, %s752_s17  }
   0x7   : > { %s30_s24 = sadd.s32 1, %s596_s21  ;;  %s139_s25 = sadd.s32 1, %s588_s19 }
   0x8   : > { %p32_p0 = scmp.ge.s32.totalorder %s30_s24, 2  ;;  %p149_p1 = scmp.ne.s32.totalorder %s588_s19, %s584_s18 }
   0x9   : > { %p150_p2 = scmp.eq.s32.totalorder %s445_s0, 1  ;;  %p155_p3 = scmp.ne.s32.totalorder %s584_s18, %s580_s17 }
   0xa   : > { %s758_s24 = smov (%p32_p0, %s30_s24), 0  ;;  %p156_p5 = scmp.eq.s32.totalorder %s446_s23, 1 }
   0xb   : > { %p672_p4 = por %p150_p2, %p149_p1  ;;  %s134_s27 = ssub.s32 %s596_s21, %s758_s24 }
   0xc   : > { %p449_p6 = scmp.ge.s32.totalorder %s600_s22, 1  ;;  %p137_p7 = scmp.eq.s32.totalorder %s134_s27, 0 }
   0xd   : > { %p679_p8 = por %p156_p5, %p155_p3  ;;  %p204_p9 = scmp.lt.s32.totalorder %s600_s22, 3 }
   0xe   : > { %s685_s29 = scalar_select %p137_p7, %s588_s19, %s139_s25  }
   0xf   : > { %p205_p10 = pnand %p449_p6, %p204_p9 }
  0x10   : > { %p242_p11 = scmp.lt.s32.totalorder (!%p205_p10), %s592_s20, 1  ;;  %s260_s30 = sld [smem:[#allocation3]] (!%p205_p10) }
  0x11   : > { %208 = sbr.rel (%p205_p10) target bundleno = 296 (0x128), region = 36  ;;  %s602_s14 = smov (!%p205_p10), 126  }
  0x12   : > { %s603_s15 = smov (!%p205_p10), 127   ;;  %s239_s23 = sand.u32 (!%p205_p10), 1, %s584_s18  }
  0x13   : > { %s450_s25 = sshll.u32 (!%p205_p10), %s239_s23, 3  ;;  %s457_s27 = sshll.u32 (!%p205_p10), %s592_s20, 3 }
  0x14   : > { %s241_s7 = scalar_lea.vmem (!%p205_p10), [#allocation4], %s450_s25 }
  0x15   : > { %s350_s8 = sshll.u32 (!%p205_p10), %s241_s7, 4  ;;  %s351_s8 = int_to_ptr.vmem [resolvable:$true] %s350_s8 }
  0x16   : > { %s243_s5 = scalar_select %p242_p11, %s592_s20, 1  ;;  %v263_v0 = vstv %s260_s30  ;;  %vm295_vm2 = vcmask 1031168   ;;  %vm275_vm3 = vcmask 1039360   ;;  %vm305_vm4 = vcmask 1048560   ;;  %v307_v14 = vld [vmem:[%s746_s3] sm:$0xff] }
  0x17   : > { %vm285_vm5 = vcmask 1048568   ;;  %vm311_vm6 = vcmask 195584  }
  0x18   : > { %s460_s6 = sshll.u32 %s243_s5, 4 }
  0x19   : > { %s249_s9 = scalar_lea.vmem %s744_s1, %s460_s6  ;;  %s462_s10 = sadd.s32 8, %s460_s6 }
  0x1a   : > { %v287_v1 = vld [vmem:[%s249_s9] sm:$0xff]  ;;  %s258_s13 = scalar_lea.vmem %s745_s2, %s462_s10  ;;  %s348_s6 = scalar_lea.hbm %s747_s4, %s457_s27 }
  0x1b   : > { %v288_v2 = vand.u32 2147483647, %v287_v1  ;;  %v297_v3 = vld [vmem:[%s258_s13] sm:$0xff]  ;;  %s352_s9 = sshll.u32 %s348_s6, 4  ;;  %s337_s10 = scalar_lea.sflag [#allocation5], %s239_s23  ;;  %s353_s9 = int_to_ptr.hbm [resolvable:$true] %s352_s9 }
  0x1c   : > { %v298_v5 = vand.u32 2147483647, %v297_v3  ;;  %s536_s11 = sshra.s32 %s353_s9, 4  ;;  %s537_s11 = int_to_ptr.hbm [resolvable:$true] %s536_s11 }
  0x1d   : > { %vm695_vm0 = vcmp.ge.f32.partialorder %v288_v2, %v263_v0  ;;  %s538_s12 = scalar_lea.hbm %s537_s11, 8  ;;  %p543_p1 = scmp.lt.s32.totalorder %s537_s11, %s747_s4 }
  0x1e   : > { %v290_v6 = vsel %vm695_vm0, %v287_v1, 0.0  ;;  %vm299_vm1 = vcmp.ge.f32.partialorder %v298_v5, %v263_v0  ;;  %p539_p12 = scmp.ne.s32.totalorder %s537_s11, %s538_s12 }
  0x1f   : > { %292 = vrot.lane.b32.xlu0 %v290_v6, %s602_s14  ;;  %272 = vrot.lane.b32.xlu1 %v290_v6, %s603_s15  ;;  %v300_v7 = vsel %vm299_vm1, %v297_v3, 0.0 }
  0x20   : > { %p540_p13 = pnand %p539_p12, %p672_p4 }
  0x22   : > { %p541_p0 = pneg %p540_p13 }
  0x27   : > { %302 = vrot.lane.b32.xlu0 %v300_v7, %s602_s14  ;;  %282 = vrot.lane.b32.xlu1 %v300_v7, %s603_s15  ;;  %s542_s14 = scalar_lea.hbm %s747_s4, 16 }
  0x28   : > { %p544_p2 = scmp.lt.s32.totalorder %s542_s14, %s538_s12 }
  0x2a   : > { %p545_p3 = por %p544_p2, %p543_p1 }
  0x2c   : > { %p546_p5 = pnand %p545_p3, %p541_p0 }
  0x91   : > { %v293_v8 = vpop.permute.xlu0 %292  ;;  %v273_v9 = vpop.permute.xlu1 %272 }
  0x92   : > { %296 = vst.msk [vmem:[#allocation2 + $0x10] sm:$0xff] %vm295_vm2, %v293_v8 }
  0x93   : > { %276 = vst.msk [vmem:[#allocation2 + $0x8] sm:$0xff] %vm275_vm3, %v273_v9 }
  0x99   : > { %v303_v10 = vpop.permute.xlu0 %302  ;;  %v283_v11 = vpop.permute.xlu1 %282 }
  0x9a   : > { %306 = vst.msk [vmem:[#allocation2 + $0x10] sm:$0xff] %vm305_vm4, %v303_v10 }
  0x9b   : > { %286 = vst.msk [vmem:[#allocation2 + $0x8] sm:$0xff] %vm285_vm5, %v283_v11 }
  0xa1   : > { %v310_v12 = vld [vmem:[#allocation2 + $0x10] sm:$0xff] }
  0xa2   : > { %328 = vmatpush.msra.mxu0 %v310_v12  ;;  %v309_v13 = vld [vmem:[#allocation2 + $0x8] sm:$0xff] }
  0xa4   : > { %329 = vmatpush.msra.mxu0 %v309_v13 }
  0xa6   : > { %521 = vmatpush.msk.msra.mxu0 %vm695_vm0, %v287_v1 }
  0xa7   : > { %455 = vmatmul.msk.f32.vlgmr.msra.gmra.mxu0 %vm311_vm6, %v307_v14 }
 0x124   : > { %v332_v15 = vpop.f32.mrf.mxu0 }
 0x125   : > { %335 = vst [vmem:[%s241_s7] sm:$0xff] %v332_v15 }
 0x126   : > { %549 = shalt.err (!%p546_p5)
}
 0x127   : > { %464 = dma.vmem_to_hbm [thread:$0]  (%p672_p4), %s351_s8, 128, %s353_s9, %s337_s10  }
 0x128 PF: > { %p470_p6 = scmp.ge.s32.totalorder %s600_s22, 2  ;;  %s364_s0 = sand.u32 1, %s580_s17  }
 0x129   : > { %s365_s23 = scalar_lea.sflag [#allocation5], %s364_s0 }
 0x12a   : > { %p467_p7 = pnand %p470_p6, %p679_p8 }
 0x12c   : > { %p468_p9 = pneg %p467_p7 }
 0x12e   : > { %575 = dma.done.wait (%p468_p9), %s365_s23, 128  }
 0x12f   : > { %577 = vsyncadd (%p468_p9), %s365_s23, 4294967168  ;;  %s18_s22 = sadd.s32 1, %s600_s22   ;;  %s752_s17 = smov %s584_s18 }
 0x130   : > { %p15_p10 = scmp.ge.s32.totalorder %s18_s22, 4   ;;  %s753_s18 = smov %s588_s19 }
 0x131   : > { %s754_s19 = smov %s685_s29  ;;  %s755_s20 = smov %s596_s21 }
 0x132   : > { %s756_s21 = smov %s758_s24  ;;  %17 = sbr.rel (!%p15_p10) target bundleno = 6 (0x6), region = 74 }
 0x137   :  { %371 = vsyncpa [#allocation5], 1 }
 0x138   :  { %373 = vsyncpa [#allocation5 + $0x1], 1 }

</bundles_post_ra>
